<compile_context>
chip_gen: v5e
topology: v5e:2x2
jax: 0.10.0
libtpu: 0.0.40
codegen_flags: <defaults>
</compile_context>

<pallas_src>
import math

import jax
import jax.numpy as jnp
from jax.experimental import pallas as pl
from jax.experimental.pallas import tpu as pltpu


# ----------------------------------------------------------------------------
# Kernel: one lane-dense matmul + bias (everything else is folded into W_big)
# ----------------------------------------------------------------------------

def _gcn_mm_kernel(x_ref, w_ref, b_ref, o_ref):
    """out = x @ W_big + bias.

    x_ref : VMEM (rows, K*C)   bf16   packed node-major activations
    w_ref : VMEM (K*C, K*C)    bf16   adjacency-polynomial-folded 1x1-conv
    b_ref : VMEM (1, K*C)      f32    bias, tiled across the K node blocks
    o_ref : VMEM (rows, K*C)   f32    packed output
    """
    o_ref[...] = jnp.dot(x_ref[...], w_ref[...],
                         preferred_element_type=jnp.float32) + b_ref[...]


def _pick_row_block(n):
    """Largest power-of-two row block (multiple of 8, <=1024) dividing n."""
    if n % 8 != 0:
        return n                      # full-extent block is always legal
    for cand in (1024, 512, 256, 128, 64, 32, 16, 8):
        if n % cand == 0:
            return cand
    return n


# ----------------------------------------------------------------------------
# Wrapper: weight folding + layout plumbing (all heavy compute in the kernel)
# ----------------------------------------------------------------------------

def adaptive_gcn(x, base_shape, support_adp, params, *,
                 order=2, include_self=True, is_adp=True):
    B, C, K, L = base_shape
    if K == 1:
        return x

    hp = jax.lax.Precision.HIGHEST

    # Adaptive adjacency: tiny (K, EMB) @ (EMB, K) + relu + row softmax.
    if is_adp:
        nv1, nv2 = support_adp[-1]
        support = list(support_adp[:-1])
        adp = jax.nn.softmax(
            jnp.maximum(jnp.dot(nv1, nv2, precision=hp), 0.0), axis=1)
        support = support + [adp]
    else:
        support = list(support_adp)

    n_support = len(support)
    n_branch = (1 if include_self else 0) + order * n_support

    # Branch matrices P_i, in the exact order the reference concatenates them.
    mats = []
    if include_self:
        mats.append(jnp.eye(K, dtype=jnp.float32))
    for a in support:
        ap = a.astype(jnp.float32)
        mats.append(ap)
        for _ in range(2, order + 1):
            ap = jnp.dot(ap, a.astype(jnp.float32), precision=hp)
            mats.append(ap)
    P = jnp.stack(mats)                                    # (n_branch, K, K)

    w = jnp.asarray(params['mlp_w'], jnp.float32)          # (C, n_branch*C)
    b = jnp.asarray(params['mlp_b'], jnp.float32)          # (C,)
    assert w.shape == (C, n_branch * C), w.shape
    wT_blocks = w.T.reshape(n_branch, C, C)                # block i = W_i^T

    # Fold the adjacency polynomial into the conv weights:
    #   W_big[v*C + c, w*C + d] = sum_i P_i[w, v] * W[d, i*C + c]
    W_big = jnp.einsum('iwv,icd->vcwd', P, wT_blocks, precision=hp)
    W_big = W_big.reshape(K * C, K * C).astype(jnp.bfloat16)
    bias = jnp.tile(b, K).reshape(1, K * C)                # f32, (1, K*C)

    # Pack x lane-dense: (B, C, K*L) -> (N, K*C), N = B*L, node-major blocks.
    N = B * L
    KC = K * C
    x_packed = (x.reshape(B, C, K, L).transpose(0, 3, 2, 1)   # (B, L, K, C)
                 .reshape(N, KC).astype(jnp.bfloat16))

    row_block = _pick_row_block(N)
    grid = (N // row_block,) if N % row_block == 0 else (1,)

    out_packed = pl.pallas_call(
        _gcn_mm_kernel,
        out_shape=jax.ShapeDtypeStruct((N, KC), jnp.float32),
        grid_spec=pltpu.PrefetchScalarGridSpec(
            num_scalar_prefetch=0,
            grid=grid,
            in_specs=[
                pl.BlockSpec((row_block, KC), lambda i: (i, 0)),   # x rows
                pl.BlockSpec((KC, KC), lambda i: (0, 0)),          # W_big
                pl.BlockSpec((1, KC), lambda i: (0, 0)),           # bias
            ],
            out_specs=pl.BlockSpec((row_block, KC), lambda i: (i, 0)),
        ),
        compiler_params=pltpu.CompilerParams(
            dimension_semantics=("parallel",)),
    )(x_packed, W_big, bias)

    # Unpack: (N, K*C) -> (B, C, K*L); matches the reference
    # reshape(B, L, C, K).permute(0, 2, 3, 1).reshape(B, C, K*L).
    out = (out_packed.reshape(B, L, K, C).transpose(0, 3, 2, 1)   # (B,C,K,L)
                     .reshape(B, C, K * L))
    return out


# ----------------------------------------------------------------------------
# Plain-JAX reference (mirrors the PyTorch module) for a correctness check
# ----------------------------------------------------------------------------

def adaptive_gcn_reference(x, base_shape, support_adp, params, *,
                           order=2, include_self=True, is_adp=True):
    B, C, K, L = base_shape
    if K == 1:
        return x
    if is_adp:
        nv1, nv2 = support_adp[-1]
        support = list(support_adp[:-1])
        adp = jax.nn.softmax(jnp.maximum(nv1 @ nv2, 0.0), axis=1)
        support = support + [adp]
    else:
        support = list(support_adp)
    hp = jax.lax.Precision.HIGHEST
    xr = x.reshape(B, C, K, L).transpose(0, 3, 1, 2).reshape(B * L, C, K)
    xr = xr[..., None]                                    # (N, C, K, 1)
    out = [xr] if include_self else []
    for a in support:
        x1 = jnp.einsum('ncvl,wv->ncwl', xr, a, precision=hp)
        out.append(x1)
        for _ in range(2, order + 1):
            x1 = jnp.einsum('ncvl,wv->ncwl', x1, a, precision=hp)
            out.append(x1)
    cat = jnp.concatenate(out, axis=1)                    # (N, n_branch*C, K, 1)
    w = jnp.asarray(params['mlp_w'], jnp.float32)
    b = jnp.asarray(params['mlp_b'], jnp.float32)
    conv = jnp.einsum('oi,nivl->novl', w, cat, precision=hp) + b[None, :, None, None]
    conv = conv[..., 0]                                   # (N, C, K)
    return conv.reshape(B, L, C, K).transpose(0, 2, 3, 1).reshape(B, C, K * L)


# ----------------------------------------------------------------------------
# Main
# ----------------------------------------------------------------------------

if __name__ == "__main__":
    B, C, K, L = 2, 64, 4, 8          # base_shape; input is (B, C, K*L)
    EMB = 16                          # adaptive node-embedding size
    ORDER = 2
    SUPPORT_LEN = 3                   # 2 static adjacencies + 1 adaptive

    key = jax.random.PRNGKey(0)
    k_x, k_a1, k_a2, k_n1, k_n2, k_w, k_b = jax.random.split(key, 7)

    x = jax.random.normal(k_x, (B, C, K * L), jnp.float32)
    A1 = jax.nn.softmax(jax.random.normal(k_a1, (K, K), jnp.float32), axis=1)
    A2 = jax.nn.softmax(jax.random.normal(k_a2, (K, K), jnp.float32), axis=1)
    nodevec1 = jax.random.normal(k_n1, (K, EMB), jnp.float32) * 0.5
    nodevec2 = jax.random.normal(k_n2, (EMB, K), jnp.float32) * 0.5
    support_adp = [A1, A2, (nodevec1, nodevec2)]          # is_adp=True convention

    c_in = (ORDER * SUPPORT_LEN + 1) * C                  # include_self=True
    params = {
        'mlp_w': jax.random.normal(k_w, (C, c_in), jnp.float32) / math.sqrt(c_in),
        'mlp_b': jax.random.normal(k_b, (C,), jnp.float32) * 0.01,
    }

    out = adaptive_gcn(x, (B, C, K, L), support_adp, params, order=ORDER)
    out = jax.block_until_ready(out)

    assert out.shape == (B, C, K * L), out.shape
    assert bool(jnp.all(jnp.isfinite(out)))

    # bf16 MXU operands with f32 accumulation vs. HIGHEST-precision reference:
    # the 5e-2 tolerance comfortably absorbs the bf16 operand rounding.
    ref = adaptive_gcn_reference(x, (B, C, K, L), support_adp, params, order=ORDER)
    err = float(jnp.max(jnp.abs(out - ref)))
    assert err < 5e-2, f"max |pallas - ref| = {err}"

    print("KERNEL_OK")
</pallas_src>

<mosaic_0001>
module attributes {stable_mosaic.version = 11 : i64} {
  func.func @_gcn_mm_kernel(%arg0: i32, %arg1: memref<16x256xbf16, #tpu.memory_space<vmem>>, %arg2: memref<256x256xbf16, #tpu.memory_space<vmem>>, %arg3: memref<1x256xf32, #tpu.memory_space<vmem>>, %arg4: memref<16x256xf32, #tpu.memory_space<vmem>>) attributes {dimension_semantics = [#tpu.dimension_semantics<parallel>], iteration_bounds = array<i64: 1>, scalar_prefetch = 0 : i64, scratch_operands = 0 : i64, tpu.core_type = #tpu.core_type<tc>, window_params = [{transform_indices = @transform_0, window_bounds = array<i64: 16, 256>}, {pipeline_mode = #tpu.pipeline_mode<synchronous>, transform_indices = @transform_1, window_bounds = array<i64: 256, 256>}, {pipeline_mode = #tpu.pipeline_mode<synchronous>, transform_indices = @transform_2, window_bounds = array<i64: 1, 256>}, {transform_indices = @transform_3, window_bounds = array<i64: 16, 256>}]} {
    %c0 = arith.constant 0 : index
    %c0_0 = arith.constant 0 : index
    %0 = vector.load %arg1[%c0, %c0_0] : memref<16x256xbf16, #tpu.memory_space<vmem>>, vector<16x256xbf16>
    %c0_1 = arith.constant 0 : index
    %c0_2 = arith.constant 0 : index
    %1 = vector.load %arg2[%c0_1, %c0_2] : memref<256x256xbf16, #tpu.memory_space<vmem>>, vector<256x256xbf16>
    %cst = arith.constant dense<0.000000e+00> : vector<16x256xf32>
    %2 = tpu.matmul %0, %1, %cst {dimension_numbers = #tpu.dot_dimension_numbers<[1], [0], [0], [1], [0, 0, 1, 1], [], []>} : vector<16x256xbf16>, vector<256x256xbf16>, vector<16x256xf32> -> vector<16x256xf32>
    %c0_3 = arith.constant 0 : index
    %c0_4 = arith.constant 0 : index
    %3 = vector.load %arg3[%c0_3, %c0_4] : memref<1x256xf32, #tpu.memory_space<vmem>>, vector<1x256xf32>
    %4 = vector.broadcast %3 : vector<1x256xf32> to vector<16x256xf32>
    %5 = arith.addf %2, %4 : vector<16x256xf32>
    %c0_5 = arith.constant 0 : index
    %c0_6 = arith.constant 0 : index
    %6 = vector.load %arg4[%c0_5, %c0_6] : memref<16x256xf32, #tpu.memory_space<vmem>>, vector<16x256xf32>
    tpu.vector_store %arg4[%c0_5, %c0_6], %5 {strides = array<i32>} : memref<16x256xf32, #tpu.memory_space<vmem>>, vector<16x256xf32>,
    return
  }
  func.func @transform_0(%arg0: i32) -> (i32, i32) {
    %c0_i32 = arith.constant 0 : i32
    %c0_i32_0 = arith.constant 0 : i32
    return %arg0, %c0_i32 : i32, i32
  }
  func.func @transform_1(%arg0: i32) -> (i32, i32) {
    %c0_i32 = arith.constant 0 : i32
    %c0_i32_0 = arith.constant 0 : i32
    %c0_i32_1 = arith.constant 0 : i32
    return %c0_i32, %c0_i32_0 : i32, i32
  }
  func.func @transform_2(%arg0: i32) -> (i32, i32) {
    %c0_i32 = arith.constant 0 : i32
    %c0_i32_0 = arith.constant 0 : i32
    %c0_i32_1 = arith.constant 0 : i32
    return %c0_i32, %c0_i32_0 : i32, i32
  }
  func.func @transform_3(%arg0: i32) -> (i32, i32) {
    %c0_i32 = arith.constant 0 : i32
    %c0_i32_0 = arith.constant 0 : i32
    return %arg0, %c0_i32 : i32, i32
  }
}

</mosaic_0001>

<bundles_post_ra>
// kernel: tpu_custom_call.1
= control target key start
LH: loop header
LB: loop body
LE: loop exit
PB: predicated region body
PF: predicated region fallthrough
CT: control target
= control target key end

     0   :  { %8 = vsyncpa [#allocation3], 0  ;;  %s670_s0 = inlined_call_operand.hbm [shape: bf16[16,256], index: 0, kind: input, shape index: {}]   ;;  %s671_s1 = inlined_call_operand.hbm [shape: bf16[256,256], index: 1, kind: input, shape index: {}]   ;;  %s672_s2 = inlined_call_operand.hbm [shape: f32[1,256], index: 2, kind: input, shape index: {}]   ;;  %s673_s3 = inlined_call_operand.hbm [shape: f32[16,256], index: 3, kind: output, shape index: {}]  }
   0x1   :  { %9 = vsyncpa [#allocation6], 0 }
   0x2   :  { %10 = vsyncpa [#allocation4], 0  ;;  %s28_s14 = sshll.u32 %s671_s1, 4  ;;  %s630_s15 = smov [#allocation5]   ;;  %s29_s14 = int_to_ptr.hbm [resolvable:$true] %s28_s14 }
   0x3   :  { %s30_s16 = sshll.u32 %s630_s15, 4  ;;  %s15_s19 = sshll.u32 %s670_s0, 4  ;;  %s31_s16 = int_to_ptr.vmem [resolvable:$true] %s30_s16  ;;  %s16_s19 = int_to_ptr.hbm [resolvable:$true] %s15_s19 }
   0x4   :  { %s631_s20 = smov 128   ;;  %s632_s21 = smov 8  }
   0x5   :  { %36 = dma.hbm_to_vmem [thread:$0]  %s29_s14, 4096, %s31_s16, [#allocation6], %s631_s20, %s631_s20, %s632_s21  }
   0x6   :  { %s633_s22 = smov [#allocation2]   ;;  %s42_s26 = sshll.u32 %s672_s2, 4  ;;  %s43_s26 = int_to_ptr.hbm [resolvable:$true] %s42_s26 }
   0x7   :  { %s17_s23 = sshll.u32 %s633_s22, 4  ;;  %s634_s1 = smov [#allocation7]   ;;  %s18_s23 = int_to_ptr.vmem [resolvable:$true] %s17_s23 }
   0x8   :  { %23 = dma.hbm_to_vmem [thread:$0]  %s16_s19, 256, %s18_s23, [#allocation3], %s631_s20, %s631_s20, %s632_s21  }
   0x9   :  { %s44_s27 = sshll.u32 %s634_s1, 4  ;;  %s45_s27 = int_to_ptr.vmem [resolvable:$true] %s44_s27 }
   0xa   :  { %47 = dma.hbm_to_vmem [thread:$0]  %s43_s26, 32, %s45_s27, [#allocation6]  }
   0xb   :  { %624 = dma.done.wait [#allocation3], 256  }
   0xc   :  { %625 = vsyncadd [#allocation3], 4294967040 }
   0xd   :  { %626 = dma.done.wait [#allocation6], 4128  }
   0xe   :  { %627 = vsyncadd [#allocation6], 4294963168  ;;  %v416_v0 = vld [vmem:[#allocation5 + $0x70] sm:$0xf]  ;;  %v503_v1 = vld [vmem:[#allocation5 + $0x74] sm:$0xf0] }
   0xf   :  { %v480_v2 = vld [vmem:[#allocation5 + $0xf0] sm:$0xf]  ;;  %v417_v3 = vor.u32 %v503_v1, %v416_v0  ;;  %v519_v4 = vld [vmem:[#allocation5 + $0xf4] sm:$0xf0]  ;;  %v502_v5 = vld [vmem:[#allocation5 + $0x74] sm:$0xf] }
  0x10   :  { %v418_v6 = vld [vmem:[#allocation5 + $0x78] sm:$0xf0]  ;;  %v481_v7 = vor.u32 %v519_v4, %v480_v2  ;;  %v518_v9 = vld [vmem:[#allocation5 + $0xf4] sm:$0xf]  ;;  %v408_v11 = vld [vmem:[#allocation5 + $0x60] sm:$0xf] }
  0x11   :  { %v421_v8 = vor.u32 %v502_v5, %v418_v6  ;;  %v482_v10 = vld [vmem:[#allocation5 + $0xf8] sm:$0xf0]  ;;  %270 = vmatpush.bf16.msra.mxu0 %v417_v3  ;;  %v501_v13 = vld [vmem:[#allocation5 + $0x64] sm:$0xf0]  ;;  %v472_v14 = vld [vmem:[#allocation5 + $0xe0] sm:$0xf] }
  0x12   :  { %v485_v12 = vor.u32 %v518_v9, %v482_v10  ;;  %v517_v15 = vld [vmem:[#allocation5 + $0xe4] sm:$0xf0]  ;;  %284 = vmatpush.bf16.msra.mxu1 %v481_v7  ;;  %v409_v16 = vor.u32 %v501_v13, %v408_v11  ;;  %v500_v18 = vld [vmem:[#allocation5 + $0x64] sm:$0xf]  ;;  %v410_v19 = vld [vmem:[#allocation5 + $0x68] sm:$0xf0] }
  0x13   :  { %298 = vmatpush.bf16.msra.mxu2 %v421_v8  ;;  %v473_v17 = vor.u32 %v517_v15, %v472_v14  ;;  %v516_v20 = vld [vmem:[#allocation5 + $0xe4] sm:$0xf]  ;;  %v413_v21 = vor.u32 %v500_v18, %v410_v19  ;;  %v474_v22 = vld [vmem:[#allocation5 + $0xe8] sm:$0xf0]  ;;  %v400_v23 = vld [vmem:[#allocation5 + $0x50] sm:$0xf] }
  0x14   :  { %312 = vmatpush.bf16.msra.mxu3 %v485_v12  ;;  %v499_v24 = vld [vmem:[#allocation5 + $0x54] sm:$0xf0]  ;;  %v477_v25 = vor.u32 %v516_v20, %v474_v22  ;;  %v464_v26 = vld [vmem:[#allocation5 + $0xd0] sm:$0xf]  ;;  %v498_v28 = vld [vmem:[#allocation5 + $0x54] sm:$0xf] }
  0x15   :  { %v515_v27 = vld [vmem:[#allocation5 + $0xd4] sm:$0xf0]  ;;  %271 = vmatpush.bf16.msra.mxu0 %v409_v16  ;;  %v401_v29 = vor.u32 %v499_v24, %v400_v23  ;;  %v402_v30 = vld [vmem:[#allocation5 + $0x58] sm:$0xf0]  ;;  %v514_v31 = vld [vmem:[#allocation5 + $0xd4] sm:$0xf] }
  0x16   :  { %v466_v32 = vld [vmem:[#allocation5 + $0xd8] sm:$0xf0]  ;;  %285 = vmatpush.bf16.msra.mxu1 %v473_v17  ;;  %v465_v33 = vor.u32 %v515_v27, %v464_v26  ;;  %v405_v34 = vor.u32 %v498_v28, %v402_v30  ;;  %v392_v35 = vld [vmem:[#allocation5 + $0x40] sm:$0xf]  ;;  %v497_v36 = vld [vmem:[#allocation5 + $0x44] sm:$0xf0] }
  0x17   :  { %299 = vmatpush.bf16.msra.mxu2 %v413_v21  ;;  %v456_v37 = vld [vmem:[#allocation5 + $0xc0] sm:$0xf]  ;;  %v469_v38 = vor.u32 %v514_v31, %v466_v32  ;;  %v513_v39 = vld [vmem:[#allocation5 + $0xc4] sm:$0xf0]  ;;  %v496_v40 = vld [vmem:[#allocation5 + $0x44] sm:$0xf]  ;;  %v393_v44 = vor.u32 %v497_v36, %v392_v35 }
  0x18   :  { %313 = vmatpush.bf16.msra.mxu3 %v477_v25  ;;  %v394_v41 = vld [vmem:[#allocation5 + $0x48] sm:$0xf0]  ;;  %v512_v42 = vld [vmem:[#allocation5 + $0xc4] sm:$0xf]  ;;  %v457_v45 = vor.u32 %v513_v39, %v456_v37  ;;  %v384_v47 = vld [vmem:[#allocation5 + $0x30] sm:$0xf] }
  0x19   :  { %v458_v43 = vld [vmem:[#allocation5 + $0xc8] sm:$0xf0]  ;;  %272 = vmatpush.bf16.msra.mxu0 %v401_v29  ;;  %v397_v46 = vor.u32 %v496_v40, %v394_v41  ;;  %v495_v48 = vld [vmem:[#allocation5 + $0x34] sm:$0xf0]  ;;  %v448_v49 = vld [vmem:[#allocation5 + $0xb0] sm:$0xf] }
  0x1a   :  { %286 = vmatpush.bf16.msra.mxu1 %v465_v33  ;;  %v461_v50 = vor.u32 %v512_v42, %v458_v43  ;;  %v511_v51 = vld [vmem:[#allocation5 + $0xb4] sm:$0xf0]  ;;  %v494_v52 = vld [vmem:[#allocation5 + $0x34] sm:$0xf]  ;;  %v386_v53 = vld [vmem:[#allocation5 + $0x38] sm:$0xf0]  ;;  %v385_v56 = vor.u32 %v495_v48, %v384_v47 }
  0x1b   :  { %300 = vmatpush.bf16.msra.mxu2 %v405_v34  ;;  %v510_v54 = vld [vmem:[#allocation5 + $0xb4] sm:$0xf]  ;;  %v450_v55 = vld [vmem:[#allocation5 + $0xb8] sm:$0xf0]  ;;  %v449_v57 = vor.u32 %v511_v51, %v448_v49  ;;  %v389_v58 = vor.u32 %v494_v52, %v386_v53  ;;  %v376_v59 = vld [vmem:[#allocation5 + $0x20] sm:$0xf] }
  0x1c   :  { %314 = vmatpush.bf16.msra.mxu3 %v469_v38  ;;  %v493_v60 = vld [vmem:[#allocation5 + $0x24] sm:$0xf0]  ;;  %v440_v61 = vld [vmem:[#allocation5 + $0xa0] sm:$0xf]  ;;  %v453_v62 = vor.u32 %v510_v54, %v450_v55  ;;  %v492_v0 = vld [vmem:[#allocation5 + $0x24] sm:$0xf] }
  0x1d   :  { %273 = vmatpush.bf16.msra.mxu0 %v393_v44  ;;  %v509_v63 = vld [vmem:[#allocation5 + $0xa4] sm:$0xf0]  ;;  %v378_v1 = vld [vmem:[#allocation5 + $0x28] sm:$0xf0]  ;;  %v508_v2 = vld [vmem:[#allocation5 + $0xa4] sm:$0xf]  ;;  %v377_v4 = vor.u32 %v493_v60, %v376_v59 }
  0x1e   :  { %287 = vmatpush.bf16.msra.mxu1 %v457_v45  ;;  %v442_v3 = vld [vmem:[#allocation5 + $0xa8] sm:$0xf0]  ;;  %v441_v5 = vor.u32 %v509_v63, %v440_v61  ;;  %v381_v6 = vor.u32 %v492_v0, %v378_v1  ;;  %v368_v7 = vld [vmem:[#allocation5 + $0x10] sm:$0xf]  ;;  %v491_v8 = vld [vmem:[#allocation5 + $0x14] sm:$0xf0] }
  0x1f   :  { %301 = vmatpush.bf16.msra.mxu2 %v397_v46  ;;  %v432_v9 = vld [vmem:[#allocation5 + $0x90] sm:$0xf]  ;;  %v445_v10 = vor.u32 %v508_v2, %v442_v3  ;;  %v507_v11 = vld [vmem:[#allocation5 + $0x94] sm:$0xf0]  ;;  %v490_v12 = vld [vmem:[#allocation5 + $0x14] sm:$0xf]  ;;  %v369_v16 = vor.u32 %v491_v8, %v368_v7 }
  0x20   :  { %315 = vmatpush.bf16.msra.mxu3 %v461_v50  ;;  %v370_v13 = vld [vmem:[#allocation5 + $0x18] sm:$0xf0]  ;;  %v506_v14 = vld [vmem:[#allocation5 + $0x94] sm:$0xf]  ;;  %v433_v17 = vor.u32 %v507_v11, %v432_v9  ;;  %v360_v19 = vld [vmem:[#allocation5] sm:$0xf] }
  0x21   :  { %274 = vmatpush.bf16.msra.mxu0 %v385_v56  ;;  %v434_v15 = vld [vmem:[#allocation5 + $0x98] sm:$0xf0]  ;;  %v373_v18 = vor.u32 %v490_v12, %v370_v13  ;;  %v489_v20 = vld [vmem:[#allocation5 + $0x4] sm:$0xf0]  ;;  %v424_v21 = vld [vmem:[#allocation5 + $0x80] sm:$0xf] }
  0x22   :  { %288 = vmatpush.bf16.msra.mxu1 %v449_v57  ;;  %v437_v22 = vor.u32 %v506_v14, %v434_v15  ;;  %v505_v23 = vld [vmem:[#allocation5 + $0x84] sm:$0xf0]  ;;  %v488_v24 = vld [vmem:[#allocation5 + $0x4] sm:$0xf]  ;;  %v362_v25 = vld [vmem:[#allocation5 + $0x8] sm:$0xf0]  ;;  %v361_v28 = vor.u32 %v489_v20, %v360_v19 }
  0x23   :  { %302 = vmatpush.bf16.msra.mxu2 %v389_v58  ;;  %v504_v26 = vld [vmem:[#allocation5 + $0x84] sm:$0xf]  ;;  %v426_v27 = vld [vmem:[#allocation5 + $0x88] sm:$0xf0]  ;;  %v352_v29 = vld [vmem:[#allocation2] sm:$0xf]  ;;  %v425_v31 = vor.u32 %v505_v23, %v424_v21  ;;  %v365_v32 = vor.u32 %v488_v24, %v362_v25 }
  0x24   :  { %316 = vmatpush.bf16.msra.mxu3 %v453_v62  ;;  %v487_v30 = vld [vmem:[#allocation2 + $0x4] sm:$0xf0]  ;;  %v486_v33 = vld [vmem:[#allocation2 + $0x4] sm:$0xf]  ;;  %v354_v34 = vld [vmem:[#allocation2 + $0x8] sm:$0xf0]  ;;  %v429_v35 = vor.u32 %v504_v26, %v426_v27 }
  0x25   :  { %275 = vmatpush.bf16.msra.mxu0 %v377_v4  ;;  %v353_v36 = vor.u32 %v487_v30, %v352_v29  ;;  %v357_v37 = vor.u32 %v486_v33, %v354_v34  ;;  %v94_v38 = vld [vmem:[#allocation7] sm:$0x3]  ;;  %s635_s0 = smov [#allocation8]   ;;  %s336_s30 = sshll.u32 %s673_s3, 4  ;;  %s337_s30 = int_to_ptr.hbm [resolvable:$true] %s336_s30 }
  0x26   :  { %289 = vmatpush.bf16.msra.mxu1 %v441_v5  ;;  %v96_v39 = vperm.slane %v94_v38, 0  ;;  %v97_v44 = vperm.slane %v94_v38, 1  ;;  %s334_s2 = sshll.u32 %s635_s0, 4  ;;  %s636_s4 = smov 256   ;;  %s335_s2 = int_to_ptr.vmem [resolvable:$true] %s334_s2 }
  0x27   :  { %303 = vmatpush.bf16.msra.mxu2 %v381_v6  ;;  %s637_s5 = smov 16  }
  0x28   :  { %317 = vmatpush.bf16.msra.mxu3 %v445_v10 }
  0x29   :  { %276 = vmatpush.bf16.msra.mxu0 %v369_v16 }
  0x2a   :  { %290 = vmatpush.bf16.msra.mxu1 %v433_v17 }
  0x2b   :  { %304 = vmatpush.bf16.msra.mxu2 %v373_v18 }
  0x2c   :  { %318 = vmatpush.bf16.msra.mxu3 %v437_v22 }
  0x2d   :  { %277 = vmatpush.bf16.msra.mxu0 %v361_v28 }
  0x2e   :  { %291 = vmatpush.bf16.msra.mxu1 %v425_v31 }
  0x2f   :  { %305 = vmatpush.bf16.msra.mxu2 %v365_v32 }
  0x30   :  { %319 = vmatpush.bf16.msra.mxu3 %v429_v35  ;;  %278 = vmatmul.bf16.vlgmr.msra.gmra.mxu0 %v353_v36 }
  0x31   :  { %292 = vmatmul.bf16.vlgmr.msra.gmra.mxu1 %v357_v37 }
  0x32   :  { %306 = vmatmul.bf16.vlgmr.msra.gmra.mxu2 %v353_v36 }
  0x33   :  { %320 = vmatmul.bf16.vlgmr.msra.gmra.mxu3 %v357_v37 }
  0xad   :  { %v279_v40 = vpop.f32.mrf.mxu0 }
  0xae   :  { %v280_v41 = vadd.f32 %v279_v40, %v96_v39  ;;  %v293_v42 = vpop.f32.mrf.mxu1 }
  0xb0   :  { %v294_v43 = vadd.f32 %v293_v42, %v280_v41 }
  0xb2   :  { %326 = vst [vmem:[#allocation8] sm:$0xff] %v294_v43 }
  0xb5   :  { %v307_v45 = vpop.f32.mrf.mxu2  ;;  %v281_v48 = vpop.f32.mrf.mxu0 }
  0xb6   :  { %v308_v46 = vadd.f32 %v307_v45, %v97_v44  ;;  %v321_v47 = vpop.f32.mrf.mxu3  ;;  %v282_v49 = vadd.f32 %v281_v48, %v96_v39  ;;  %v295_v51 = vpop.f32.mrf.mxu1 }
  0xb8   :  { %v322_v50 = vadd.f32 %v321_v47, %v308_v46  ;;  %v296_v52 = vadd.f32 %v295_v51, %v282_v49 }
  0xba   :  { %327 = vst [vmem:[#allocation8 + $0x8] sm:$0xff] %v322_v50 }
  0xbb   :  { %328 = vst [vmem:[#allocation8 + $0x10] sm:$0xff] %v296_v52 }
  0xbd   :  { %v309_v53 = vpop.f32.mrf.mxu2 }
  0xbe   :  { %v310_v54 = vadd.f32 %v309_v53, %v97_v44  ;;  %v323_v55 = vpop.f32.mrf.mxu3 }
  0xc0   :  { %v324_v56 = vadd.f32 %v323_v55, %v310_v54 }
  0xc2   :  { %329 = vst [vmem:[#allocation8 + $0x18] sm:$0xff] %v324_v56 }
  0xc3   :  { %342 = dma.vmem_to_hbm [thread:$0]  %s335_s2, 512, %s337_s30, [#allocation4], %s636_s4, %s636_s4, %s637_s5  }
  0xc4   :  { %628 = dma.done.wait [#allocation4], 512  }
  0xc5   :  { %629 = vsyncadd [#allocation4], 4294966784 }
  0xc6   :  { %347 = vsyncpa [#allocation3], 1 }
  0xc7   :  { %348 = vsyncpa [#allocation6], 1 }
  0xc8   :  { %349 = vsyncpa [#allocation4], 1 }

</bundles_post_ra>
